<compile_context>
chip_gen: v7x
topology: tpu7x:2x2x1
jax: 0.10.0
libtpu: 0.0.40
codegen_flags: <defaults>
</compile_context>

<pallas_src>
import functools
import math

import jax
import jax.numpy as jnp
from jax import lax
from jax.experimental import pallas as pl
from jax.experimental.pallas import tpu as pltpu

_INV_SQRT2 = 0.7071067811865476


def _layer_norm(y, gamma, beta, eps=1e-5):
    mu = jnp.mean(y, axis=-1, keepdims=True)
    var = jnp.mean((y - mu) ** 2, axis=-1, keepdims=True)
    return (y - mu) * lax.rsqrt(var + eps) * gamma + beta


def _gelu_exact(y):
    # PyTorch nn.GELU() default = exact erf-based GELU.
    return 0.5 * y * (1.0 + lax.erf(y * _INV_SQRT2))


def hvt_block_kernel(x_ref, w_in_ref, b_in_ref, w_out_ref, b_out_ref,
                     g1_ref, be1_ref, w1_ref, b1_ref, w2_ref, b2_ref,
                     g2_ref, be2_ref, o_ref, *, num_heads):
    TB, L, E = x_ref.shape
    H = num_heads
    Dh = E // H
    scale = 1.0 / math.sqrt(Dh)

    x = x_ref[...]                                   # (TB, L, E) f32
    xf = x.reshape(TB * L, E)                        # batch-major token rows
    xf_bf = xf.astype(jnp.bfloat16)

    # ---- fused QKV projection (bf16 operands, f32 accumulate) ----------------
    qkv = jnp.dot(xf_bf, w_in_ref[...],
                  preferred_element_type=jnp.float32) + b_in_ref[...]   # (TB*L, 3E)
    q_all = qkv[:, 0 * E:1 * E] * scale              # fold 1/sqrt(Dh) into q once
    k_all = qkv[:, 1 * E:2 * E]
    v_all = qkv[:, 2 * E:3 * E]

    # ---- multi-head attention: pure 2-D ops per (batch, head) ----------------
    # No in-kernel transposes; QK^T contracts the last dims directly.
    attn_rows = []
    for b in range(TB):
        r0, r1 = b * L, (b + 1) * L
        heads = []
        for h in range(H):
            c0, c1 = h * Dh, (h + 1) * Dh
            qh = q_all[r0:r1, c0:c1].astype(jnp.bfloat16)     # (L, Dh)
            kh = k_all[r0:r1, c0:c1].astype(jnp.bfloat16)
            vh = v_all[r0:r1, c0:c1].astype(jnp.bfloat16)
            s = lax.dot_general(qh, kh, (((1,), (1,)), ((), ())),
                                preferred_element_type=jnp.float32)     # (L, L)
            s = s - jnp.max(s, axis=-1, keepdims=True)
            p = jnp.exp(s)
            p = p / jnp.sum(p, axis=-1, keepdims=True)        # exact softmax denom
            heads.append(jnp.dot(p.astype(jnp.bfloat16), vh,
                                 preferred_element_type=jnp.float32))   # (L, Dh)
        attn_rows.append(jnp.concatenate(heads, axis=-1))                # (L, E)
    attn = attn_rows[0] if TB == 1 else jnp.concatenate(attn_rows, axis=0)

    # out_proj
    attn = jnp.dot(attn.astype(jnp.bfloat16), w_out_ref[...],
                   preferred_element_type=jnp.float32) + b_out_ref[...]

    # ---- residual + LayerNorm 1 (f32) ----------------------------------------
    h1 = _layer_norm(xf + attn, g1_ref[...], be1_ref[...])

    # ---- MLP: Linear(E, 4E) -> GELU -> Linear(4E, E) --------------------------
    m = jnp.dot(h1.astype(jnp.bfloat16), w1_ref[...],
                preferred_element_type=jnp.float32) + b1_ref[...]
    m = _gelu_exact(m)
    m = jnp.dot(m.astype(jnp.bfloat16), w2_ref[...],
                preferred_element_type=jnp.float32) + b2_ref[...]

    # ---- residual + LayerNorm 2 (f32) ----------------------------------------
    out = _layer_norm(h1 + m, g2_ref[...], be2_ref[...])
    o_ref[...] = out.reshape(TB, L, E)


def prepare_params(params):
    """One-time (load-time) prep: transpose projection weights to x@W layout and
    cast matmul weights to bf16 (MXU native).  Biases / LN params stay f32 and
    are stored as (1, F) rows for 2-D VMEM tiles."""
    (w_in, b_in, w_out, b_out, g1, be1, w1, b1, w2, b2, g2, be2) = params
    row = lambda v: v.reshape(1, -1).astype(jnp.float32)
    bf = jnp.bfloat16
    return (w_in.T.astype(bf), row(b_in),
            w_out.T.astype(bf), row(b_out),
            row(g1), row(be1),
            w1.T.astype(bf), row(b1),
            w2.T.astype(bf), row(b2),
            row(g2), row(be2))


def _pick_batch_tile(N, L):
    # Fold batches so each program has a decent matmul row count, but keep
    # >= 2 grid steps when N >= 2 so both v7x TensorCores get work.  Folding
    # only when L is sublane-aligned keeps the in-kernel reshape free.
    if N <= 1 or L % 8 != 0:
        return 1
    tb = max(1, min(N // 2, max(1, 128 // L), 8))
    while N % tb:
        tb -= 1
    return tb


def _vmem_limit_bytes(E, L, TB):
    weights = 12 * E * E * 2                       # bf16 weights, single-buffered
    small = 16 * E * 4                             # biases + LN params (f32)
    act_io = 2 * 2 * TB * L * E * 4                # x / out blocks, double-buffered
    interm = TB * L * (3 * E + 8 * E) * 4 + 2 * L * L * 4
    need = weights + small + act_io + interm
    cap = 64 * 1024 * 1024                         # conservative fallback (v7x)
    try:
        cap = int(pltpu.get_tpu_info().vmem_capacity_bytes)
    except Exception:
        pass
    # Leave >= 16 MiB headroom for Mosaic internal scratch / spills.
    return int(min(max(2 * need + (8 << 20), 32 << 20), cap - (16 << 20)))


def hvt_block(x, prepared_params, *, embed_dim, num_heads, batch_first=False):
    """HVTBlock forward.  x: (L, N, E) (PyTorch MHA convention) or (N, L, E) if
    batch_first=True.  Returns the same layout, f32."""
    (w_in_t, b_in, w_out_t, b_out, g1, be1,
     w1_t, b1, w2_t, b2, g2, be2) = prepared_params

    x_nle = x if batch_first else jnp.transpose(x, (1, 0, 2))
    N, L, E = x_nle.shape
    assert E == embed_dim and E % num_heads == 0

    TB = _pick_batch_tile(N, L)
    nb = N // TB

    def const_spec(arr):
        kwargs = {}
        if hasattr(pl, "Buffered"):
            kwargs["pipeline_mode"] = pl.Buffered(1)   # invariant -> single buffer
        return pl.BlockSpec(arr.shape, lambda b: (0, 0), **kwargs)

    kernel = functools.partial(hvt_block_kernel, num_heads=num_heads)

    flops = N * (24 * L * E * E + 4 * L * L * E)
    transcendentals = N * (num_heads * L * L + 4 * E * L)
    bytes_accessed = 2 * N * L * E * 4 + 12 * E * E * 2 + 16 * E * 4

    out_nle = pl.pallas_call(
        kernel,
        out_shape=jax.ShapeDtypeStruct((N, L, E), jnp.float32),
        grid_spec=pltpu.PrefetchScalarGridSpec(
            num_scalar_prefetch=0,
            grid=(nb,),
            in_specs=[
                pl.BlockSpec((TB, L, E), lambda b: (b, 0, 0)),   # x batch tile
                const_spec(w_in_t), const_spec(b_in),
                const_spec(w_out_t), const_spec(b_out),
                const_spec(g1), const_spec(be1),
                const_spec(w1_t), const_spec(b1),
                const_spec(w2_t), const_spec(b2),
                const_spec(g2), const_spec(be2),
            ],
            out_specs=pl.BlockSpec((TB, L, E), lambda b: (b, 0, 0)),
        ),
        compiler_params=pltpu.CompilerParams(
            dimension_semantics=("parallel",),
            vmem_limit_bytes=_vmem_limit_bytes(E, L, TB),
        ),
        cost_estimate=pl.CostEstimate(
            flops=flops, transcendentals=transcendentals,
            bytes_accessed=bytes_accessed),
    )(x_nle, w_in_t, b_in, w_out_t, b_out, g1, be1, w1_t, b1, w2_t, b2, g2, be2)

    return out_nle if batch_first else jnp.transpose(out_nle, (1, 0, 2))


# ------------------------- pure-JAX f32 reference (for sanity) ------------------
def hvt_block_ref(x_lne, params, *, num_heads):
    (w_in, b_in, w_out, b_out, g1, be1, w1, b1, w2, b2, g2, be2) = params
    L, N, E = x_lne.shape
    H, Dh = num_heads, E // num_heads

    def ln(y, g, b):
        mu = jnp.mean(y, -1, keepdims=True)
        var = jnp.mean((y - mu) ** 2, -1, keepdims=True)
        return (y - mu) / jnp.sqrt(var + 1e-5) * g + b

    x = jnp.transpose(x_lne, (1, 0, 2))                       # (N, L, E)
    qkv = jnp.einsum("nle,fe->nlf", x, w_in) + b_in
    q, k, v = jnp.split(qkv, 3, axis=-1)
    q = q.reshape(N, L, H, Dh).transpose(0, 2, 1, 3)
    k = k.reshape(N, L, H, Dh).transpose(0, 2, 1, 3)
    v = v.reshape(N, L, H, Dh).transpose(0, 2, 1, 3)
    s = jnp.einsum("nhqd,nhkd->nhqk", q, k) / math.sqrt(Dh)
    p = jax.nn.softmax(s, axis=-1)
    a = jnp.einsum("nhqk,nhkd->nhqd", p, v).transpose(0, 2, 1, 3).reshape(N, L, E)
    a = jnp.einsum("nle,fe->nlf", a, w_out) + b_out
    h1 = ln(x + a, g1, be1)
    m = jnp.einsum("nle,fe->nlf", h1, w1) + b1
    m = 0.5 * m * (1.0 + lax.erf(m * _INV_SQRT2))
    m = jnp.einsum("nlf,ef->nle", m, w2) + b2
    out = ln(h1 + m, g2, be2)
    return jnp.transpose(out, (1, 0, 2))


def _make_params(key, E):
    ks = jax.random.split(key, 8)
    w_in = 0.05 * jax.random.normal(ks[0], (3 * E, E), jnp.float32)   # in_proj_weight
    b_in = 0.01 * jax.random.normal(ks[1], (3 * E,), jnp.float32)     # in_proj_bias
    w_out = 0.05 * jax.random.normal(ks[2], (E, E), jnp.float32)      # out_proj.weight
    b_out = 0.01 * jax.random.normal(ks[3], (E,), jnp.float32)        # out_proj.bias
    g1 = jnp.ones((E,), jnp.float32)                                  # norm1.weight
    be1 = jnp.zeros((E,), jnp.float32)                                # norm1.bias
    w1 = 0.05 * jax.random.normal(ks[4], (4 * E, E), jnp.float32)     # mlp[0].weight
    b1 = 0.01 * jax.random.normal(ks[5], (4 * E,), jnp.float32)       # mlp[0].bias
    w2 = 0.05 * jax.random.normal(ks[6], (E, 4 * E), jnp.float32)     # mlp[2].weight
    b2 = 0.01 * jax.random.normal(ks[7], (E,), jnp.float32)           # mlp[2].bias
    g2 = jnp.ones((E,), jnp.float32)                                  # norm2.weight
    be2 = jnp.zeros((E,), jnp.float32)                                # norm2.bias
    return (w_in, b_in, w_out, b_out, g1, be1, w1, b1, w2, b2, g2, be2)


# --------------------------------- main ----------------------------------------
if __name__ == "__main__":
    root = jax.random.PRNGKey(0)

    # (L, N, E, H): primary toy config + one that exercises the batch-folding
    # (TB>1) path and a lane-dense E=128 layout.
    configs = [(8, 2, 32, 4), (16, 4, 128, 4)]

    for (L, N, E, H) in configs:
        kp, kx = jax.random.split(jax.random.fold_in(root, E), 2)
        params = _make_params(kp, E)
        prepared = prepare_params(params)      # hoisted: done once, not per call
        x = jax.random.normal(kx, (L, N, E), jnp.float32)

        fwd = jax.jit(functools.partial(hvt_block, embed_dim=E, num_heads=H))
        out = jax.block_until_ready(fwd(x, prepared))
        ref = hvt_block_ref(x, params, num_heads=H)

        assert out.shape == (L, N, E)
        err = float(jnp.max(jnp.abs(out - ref)))
        assert jnp.allclose(out, ref, atol=2.5e-2, rtol=2.5e-2), (
            f"mismatch vs reference at (L={L},N={N},E={E},H={H}); max abs err {err:.2e}")

    print("KERNEL_OK")
</pallas_src>

<mosaic_0001>
module attributes {stable_mosaic.version = 11 : i64} {
  func.func @hvt_block_kernel(%arg0: i32, %arg1: memref<1x8x32xf32, #tpu.memory_space<vmem>>, %arg2: memref<32x96xbf16, #tpu.memory_space<vmem>>, %arg3: memref<1x96xf32, #tpu.memory_space<vmem>>, %arg4: memref<32x32xbf16, #tpu.memory_space<vmem>>, %arg5: memref<1x32xf32, #tpu.memory_space<vmem>>, %arg6: memref<1x32xf32, #tpu.memory_space<vmem>>, %arg7: memref<1x32xf32, #tpu.memory_space<vmem>>, %arg8: memref<32x128xbf16, #tpu.memory_space<vmem>>, %arg9: memref<1x128xf32, #tpu.memory_space<vmem>>, %arg10: memref<128x32xbf16, #tpu.memory_space<vmem>>, %arg11: memref<1x32xf32, #tpu.memory_space<vmem>>, %arg12: memref<1x32xf32, #tpu.memory_space<vmem>>, %arg13: memref<1x32xf32, #tpu.memory_space<vmem>>, %arg14: memref<1x8x32xf32, #tpu.memory_space<vmem>>) attributes {dimension_semantics = [#tpu.dimension_semantics<parallel>], iteration_bounds = array<i64: 2>, scalar_prefetch = 0 : i64, scratch_operands = 0 : i64, tpu.core_type = #tpu.core_type<tc>, window_params = [{transform_indices = @transform_0, window_bounds = array<i64: 1, 8, 32>}, {pipeline_mode = #tpu.pipeline_mode<synchronous>, transform_indices = @transform_1, window_bounds = array<i64: 32, 96>}, {pipeline_mode = #tpu.pipeline_mode<synchronous>, transform_indices = @transform_2, window_bounds = array<i64: 1, 96>}, {pipeline_mode = #tpu.pipeline_mode<synchronous>, transform_indices = @transform_3, window_bounds = array<i64: 32, 32>}, {pipeline_mode = #tpu.pipeline_mode<synchronous>, transform_indices = @transform_4, window_bounds = array<i64: 1, 32>}, {pipeline_mode = #tpu.pipeline_mode<synchronous>, transform_indices = @transform_5, window_bounds = array<i64: 1, 32>}, {pipeline_mode = #tpu.pipeline_mode<synchronous>, transform_indices = @transform_6, window_bounds = array<i64: 1, 32>}, {pipeline_mode = #tpu.pipeline_mode<synchronous>, transform_indices = @transform_7, window_bounds = array<i64: 32, 128>}, {pipeline_mode = #tpu.pipeline_mode<synchronous>, transform_indices = @transform_8, window_bounds = array<i64: 1, 128>}, {pipeline_mode = #tpu.pipeline_mode<synchronous>, transform_indices = @transform_9, window_bounds = array<i64: 128, 32>}, {pipeline_mode = #tpu.pipeline_mode<synchronous>, transform_indices = @transform_10, window_bounds = array<i64: 1, 32>}, {pipeline_mode = #tpu.pipeline_mode<synchronous>, transform_indices = @transform_11, window_bounds = array<i64: 1, 32>}, {pipeline_mode = #tpu.pipeline_mode<synchronous>, transform_indices = @transform_12, window_bounds = array<i64: 1, 32>}, {transform_indices = @transform_13, window_bounds = array<i64: 1, 8, 32>}]} {
    %c0 = arith.constant 0 : index
    %c0_0 = arith.constant 0 : index
    %c0_1 = arith.constant 0 : index
    %0 = vector.load %arg1[%c0, %c0_0, %c0_1] : memref<1x8x32xf32, #tpu.memory_space<vmem>>, vector<1x8x32xf32>
    %1 = vector.shape_cast %0 : vector<1x8x32xf32> to vector<8x32xf32>
    %2 = arith.truncf %1 : vector<8x32xf32> to vector<8x32xbf16>
    %c0_2 = arith.constant 0 : index
    %c0_3 = arith.constant 0 : index
    %3 = vector.load %arg2[%c0_2, %c0_3] : memref<32x96xbf16, #tpu.memory_space<vmem>>, vector<32x96xbf16>
    %cst = arith.constant dense<0.000000e+00> : vector<8x96xf32>
    %4 = tpu.matmul %2, %3, %cst {dimension_numbers = #tpu.dot_dimension_numbers<[1], [0], [0], [1], [0, 0, 1, 1], [], []>} : vector<8x32xbf16>, vector<32x96xbf16>, vector<8x96xf32> -> vector<8x96xf32>
    %c0_4 = arith.constant 0 : index
    %c0_5 = arith.constant 0 : index
    %5 = vector.load %arg3[%c0_4, %c0_5] : memref<1x96xf32, #tpu.memory_space<vmem>>, vector<1x96xf32>
    %6 = vector.broadcast %5 : vector<1x96xf32> to vector<8x96xf32>
    %7 = arith.addf %4, %6 : vector<8x96xf32>
    %8 = vector.extract_strided_slice %7 {offsets = [0, 0], sizes = [8, 32], strides = [1, 1]} : vector<8x96xf32> to vector<8x32xf32>
    %cst_6 = arith.constant 0.353553385 : f32
    %9 = vector.broadcast %cst_6 : f32 to vector<8x32xf32>
    %10 = arith.mulf %8, %9 : vector<8x32xf32>
    %11 = vector.extract_strided_slice %7 {offsets = [0, 32], sizes = [8, 32], strides = [1, 1]} : vector<8x96xf32> to vector<8x32xf32>
    %12 = vector.extract_strided_slice %7 {offsets = [0, 64], sizes = [8, 32], strides = [1, 1]} : vector<8x96xf32> to vector<8x32xf32>
    %13 = vector.extract_strided_slice %10 {offsets = [0, 0], sizes = [8, 8], strides = [1, 1]} : vector<8x32xf32> to vector<8x8xf32>
    %14 = arith.truncf %13 : vector<8x8xf32> to vector<8x8xbf16>
    %15 = vector.extract_strided_slice %11 {offsets = [0, 0], sizes = [8, 8], strides = [1, 1]} : vector<8x32xf32> to vector<8x8xf32>
    %16 = arith.truncf %15 : vector<8x8xf32> to vector<8x8xbf16>
    %17 = vector.extract_strided_slice %12 {offsets = [0, 0], sizes = [8, 8], strides = [1, 1]} : vector<8x32xf32> to vector<8x8xf32>
    %18 = arith.truncf %17 : vector<8x8xf32> to vector<8x8xbf16>
    %cst_7 = arith.constant dense<0.000000e+00> : vector<8x8xf32>
    %19 = tpu.matmul %14, %16, %cst_7 {dimension_numbers = #tpu.dot_dimension_numbers<[1], [1], [0], [0], [0, 0, 1, 0], [], []>} : vector<8x8xbf16>, vector<8x8xbf16>, vector<8x8xf32> -> vector<8x8xf32>
    %cst_8 = arith.constant dense<0xFF800000> : vector<8xf32>
    %20 = vector.multi_reduction <maximumf>, %19, %cst_8 [1] : vector<8x8xf32> to vector<8xf32>
    %21 = vector.shape_cast %20 : vector<8xf32> to vector<8x1xf32>
    %22 = vector.broadcast %21 : vector<8x1xf32> to vector<8x8xf32>
    %23 = arith.subf %19, %22 : vector<8x8xf32>
    %24 = math.exp %23 : vector<8x8xf32>
    %cst_9 = arith.constant dense<0.000000e+00> : vector<8xf32>
    %25 = vector.multi_reduction <add>, %24, %cst_9 [1] : vector<8x8xf32> to vector<8xf32>
    %26 = vector.shape_cast %25 : vector<8xf32> to vector<8x1xf32>
    %27 = vector.broadcast %26 : vector<8x1xf32> to vector<8x8xf32>
    %28 = arith.divf %24, %27 : vector<8x8xf32>
    %29 = arith.truncf %28 : vector<8x8xf32> to vector<8x8xbf16>
    %cst_10 = arith.constant dense<0.000000e+00> : vector<8x8xf32>
    %30 = tpu.matmul %29, %18, %cst_10 {dimension_numbers = #tpu.dot_dimension_numbers<[1], [0], [0], [1], [0, 0, 1, 1], [], []>} : vector<8x8xbf16>, vector<8x8xbf16>, vector<8x8xf32> -> vector<8x8xf32>
    %31 = vector.extract_strided_slice %10 {offsets = [0, 8], sizes = [8, 8], strides = [1, 1]} : vector<8x32xf32> to vector<8x8xf32>
    %32 = arith.truncf %31 : vector<8x8xf32> to vector<8x8xbf16>
    %33 = vector.extract_strided_slice %11 {offsets = [0, 8], sizes = [8, 8], strides = [1, 1]} : vector<8x32xf32> to vector<8x8xf32>
    %34 = arith.truncf %33 : vector<8x8xf32> to vector<8x8xbf16>
    %35 = vector.extract_strided_slice %12 {offsets = [0, 8], sizes = [8, 8], strides = [1, 1]} : vector<8x32xf32> to vector<8x8xf32>
    %36 = arith.truncf %35 : vector<8x8xf32> to vector<8x8xbf16>
    %cst_11 = arith.constant dense<0.000000e+00> : vector<8x8xf32>
    %37 = tpu.matmul %32, %34, %cst_11 {dimension_numbers = #tpu.dot_dimension_numbers<[1], [1], [0], [0], [0, 0, 1, 0], [], []>} : vector<8x8xbf16>, vector<8x8xbf16>, vector<8x8xf32> -> vector<8x8xf32>
    %cst_12 = arith.constant dense<0xFF800000> : vector<8xf32>
    %38 = vector.multi_reduction <maximumf>, %37, %cst_12 [1] : vector<8x8xf32> to vector<8xf32>
    %39 = vector.shape_cast %38 : vector<8xf32> to vector<8x1xf32>
    %40 = vector.broadcast %39 : vector<8x1xf32> to vector<8x8xf32>
    %41 = arith.subf %37, %40 : vector<8x8xf32>
    %42 = math.exp %41 : vector<8x8xf32>
    %cst_13 = arith.constant dense<0.000000e+00> : vector<8xf32>
    %43 = vector.multi_reduction <add>, %42, %cst_13 [1] : vector<8x8xf32> to vector<8xf32>
    %44 = vector.shape_cast %43 : vector<8xf32> to vector<8x1xf32>
    %45 = vector.broadcast %44 : vector<8x1xf32> to vector<8x8xf32>
    %46 = arith.divf %42, %45 : vector<8x8xf32>
    %47 = arith.truncf %46 : vector<8x8xf32> to vector<8x8xbf16>
    %cst_14 = arith.constant dense<0.000000e+00> : vector<8x8xf32>
    %48 = tpu.matmul %47, %36, %cst_14 {dimension_numbers = #tpu.dot_dimension_numbers<[1], [0], [0], [1], [0, 0, 1, 1], [], []>} : vector<8x8xbf16>, vector<8x8xbf16>, vector<8x8xf32> -> vector<8x8xf32>
    %49 = vector.extract_strided_slice %10 {offsets = [0, 16], sizes = [8, 8], strides = [1, 1]} : vector<8x32xf32> to vector<8x8xf32>
    %50 = arith.truncf %49 : vector<8x8xf32> to vector<8x8xbf16>
    %51 = vector.extract_strided_slice %11 {offsets = [0, 16], sizes = [8, 8], strides = [1, 1]} : vector<8x32xf32> to vector<8x8xf32>
    %52 = arith.truncf %51 : vector<8x8xf32> to vector<8x8xbf16>
    %53 = vector.extract_strided_slice %12 {offsets = [0, 16], sizes = [8, 8], strides = [1, 1]} : vector<8x32xf32> to vector<8x8xf32>
    %54 = arith.truncf %53 : vector<8x8xf32> to vector<8x8xbf16>
    %cst_15 = arith.constant dense<0.000000e+00> : vector<8x8xf32>
    %55 = tpu.matmul %50, %52, %cst_15 {dimension_numbers = #tpu.dot_dimension_numbers<[1], [1], [0], [0], [0, 0, 1, 0], [], []>} : vector<8x8xbf16>, vector<8x8xbf16>, vector<8x8xf32> -> vector<8x8xf32>
    %cst_16 = arith.constant dense<0xFF800000> : vector<8xf32>
    %56 = vector.multi_reduction <maximumf>, %55, %cst_16 [1] : vector<8x8xf32> to vector<8xf32>
    %57 = vector.shape_cast %56 : vector<8xf32> to vector<8x1xf32>
    %58 = vector.broadcast %57 : vector<8x1xf32> to vector<8x8xf32>
    %59 = arith.subf %55, %58 : vector<8x8xf32>
    %60 = math.exp %59 : vector<8x8xf32>
    %cst_17 = arith.constant dense<0.000000e+00> : vector<8xf32>
    %61 = vector.multi_reduction <add>, %60, %cst_17 [1] : vector<8x8xf32> to vector<8xf32>
    %62 = vector.shape_cast %61 : vector<8xf32> to vector<8x1xf32>
    %63 = vector.broadcast %62 : vector<8x1xf32> to vector<8x8xf32>
    %64 = arith.divf %60, %63 : vector<8x8xf32>
    %65 = arith.truncf %64 : vector<8x8xf32> to vector<8x8xbf16>
    %cst_18 = arith.constant dense<0.000000e+00> : vector<8x8xf32>
    %66 = tpu.matmul %65, %54, %cst_18 {dimension_numbers = #tpu.dot_dimension_numbers<[1], [0], [0], [1], [0, 0, 1, 1], [], []>} : vector<8x8xbf16>, vector<8x8xbf16>, vector<8x8xf32> -> vector<8x8xf32>
    %67 = vector.extract_strided_slice %10 {offsets = [0, 24], sizes = [8, 8], strides = [1, 1]} : vector<8x32xf32> to vector<8x8xf32>
    %68 = arith.truncf %67 : vector<8x8xf32> to vector<8x8xbf16>
    %69 = vector.extract_strided_slice %11 {offsets = [0, 24], sizes = [8, 8], strides = [1, 1]} : vector<8x32xf32> to vector<8x8xf32>
    %70 = arith.truncf %69 : vector<8x8xf32> to vector<8x8xbf16>
    %71 = vector.extract_strided_slice %12 {offsets = [0, 24], sizes = [8, 8], strides = [1, 1]} : vector<8x32xf32> to vector<8x8xf32>
    %72 = arith.truncf %71 : vector<8x8xf32> to vector<8x8xbf16>
    %cst_19 = arith.constant dense<0.000000e+00> : vector<8x8xf32>
    %73 = tpu.matmul %68, %70, %cst_19 {dimension_numbers = #tpu.dot_dimension_numbers<[1], [1], [0], [0], [0, 0, 1, 0], [], []>} : vector<8x8xbf16>, vector<8x8xbf16>, vector<8x8xf32> -> vector<8x8xf32>
    %cst_20 = arith.constant dense<0xFF800000> : vector<8xf32>
    %74 = vector.multi_reduction <maximumf>, %73, %cst_20 [1] : vector<8x8xf32> to vector<8xf32>
    %75 = vector.shape_cast %74 : vector<8xf32> to vector<8x1xf32>
    %76 = vector.broadcast %75 : vector<8x1xf32> to vector<8x8xf32>
    %77 = arith.subf %73, %76 : vector<8x8xf32>
    %78 = math.exp %77 : vector<8x8xf32>
    %cst_21 = arith.constant dense<0.000000e+00> : vector<8xf32>
    %79 = vector.multi_reduction <add>, %78, %cst_21 [1] : vector<8x8xf32> to vector<8xf32>
    %80 = vector.shape_cast %79 : vector<8xf32> to vector<8x1xf32>
    %81 = vector.broadcast %80 : vector<8x1xf32> to vector<8x8xf32>
    %82 = arith.divf %78, %81 : vector<8x8xf32>
    %83 = arith.truncf %82 : vector<8x8xf32> to vector<8x8xbf16>
    %cst_22 = arith.constant dense<0.000000e+00> : vector<8x8xf32>
    %84 = tpu.matmul %83, %72, %cst_22 {dimension_numbers = #tpu.dot_dimension_numbers<[1], [0], [0], [1], [0, 0, 1, 1], [], []>} : vector<8x8xbf16>, vector<8x8xbf16>, vector<8x8xf32> -> vector<8x8xf32>
    %85 = tpu.concatenate %30, %48, %66, %84 in 1 : vector<8x8xf32>, vector<8x8xf32>, vector<8x8xf32>, vector<8x8xf32> -> vector<8x32xf32>
    %86 = arith.truncf %85 : vector<8x32xf32> to vector<8x32xbf16>
    %c0_23 = arith.constant 0 : index
    %c0_24 = arith.constant 0 : index
    %87 = vector.load %arg4[%c0_23, %c0_24] : memref<32x32xbf16, #tpu.memory_space<vmem>>, vector<32x32xbf16>
    %cst_25 = arith.constant dense<0.000000e+00> : vector<8x32xf32>
    %88 = tpu.matmul %86, %87, %cst_25 {dimension_numbers = #tpu.dot_dimension_numbers<[1], [0], [0], [1], [0, 0, 1, 1], [], []>} : vector<8x32xbf16>, vector<32x32xbf16>, vector<8x32xf32> -> vector<8x32xf32>
    %c0_26 = arith.constant 0 : index
    %c0_27 = arith.constant 0 : index
    %89 = vector.load %arg5[%c0_26, %c0_27] : memref<1x32xf32, #tpu.memory_space<vmem>>, vector<1x32xf32>
    %90 = vector.broadcast %89 : vector<1x32xf32> to vector<8x32xf32>
    %91 = arith.addf %88, %90 : vector<8x32xf32>
    %92 = arith.addf %1, %91 : vector<8x32xf32>
    %c0_28 = arith.constant 0 : index
    %c0_29 = arith.constant 0 : index
    %93 = vector.load %arg6[%c0_28, %c0_29] : memref<1x32xf32, #tpu.memory_space<vmem>>, vector<1x32xf32>
    %c0_30 = arith.constant 0 : index
    %c0_31 = arith.constant 0 : index
    %94 = vector.load %arg7[%c0_30, %c0_31] : memref<1x32xf32, #tpu.memory_space<vmem>>, vector<1x32xf32>
    %cst_32 = arith.constant dense<0.000000e+00> : vector<8xf32>
    %95 = vector.multi_reduction <add>, %92, %cst_32 [1] : vector<8x32xf32> to vector<8xf32>
    %96 = vector.shape_cast %95 : vector<8xf32> to vector<8x1xf32>
    %cst_33 = arith.constant 3.200000e+01 : f32
    %97 = vector.broadcast %cst_33 : f32 to vector<8x1xf32>
    %98 = arith.divf %96, %97 : vector<8x1xf32>
    %99 = vector.broadcast %98 : vector<8x1xf32> to vector<8x32xf32>
    %100 = arith.subf %92, %99 : vector<8x32xf32>
    %101 = arith.mulf %100, %100 : vector<8x32xf32>
    %cst_34 = arith.constant dense<0.000000e+00> : vector<8xf32>
    %102 = vector.multi_reduction <add>, %101, %cst_34 [1] : vector<8x32xf32> to vector<8xf32>
    %103 = vector.shape_cast %102 : vector<8xf32> to vector<8x1xf32>
    %cst_35 = arith.constant 3.200000e+01 : f32
    %104 = vector.broadcast %cst_35 : f32 to vector<8x1xf32>
    %105 = arith.divf %103, %104 : vector<8x1xf32>
    %106 = vector.broadcast %98 : vector<8x1xf32> to vector<8x32xf32>
    %107 = arith.subf %92, %106 : vector<8x32xf32>
    %cst_36 = arith.constant 9.99999974E-6 : f32
    %108 = vector.broadcast %cst_36 : f32 to vector<8x1xf32>
    %109 = arith.addf %105, %108 : vector<8x1xf32>
    %110 = math.rsqrt %109 : vector<8x1xf32>
    %111 = vector.broadcast %110 : vector<8x1xf32> to vector<8x32xf32>
    %112 = arith.mulf %107, %111 : vector<8x32xf32>
    %113 = vector.broadcast %93 : vector<1x32xf32> to vector<8x32xf32>
    %114 = arith.mulf %112, %113 : vector<8x32xf32>
    %115 = vector.broadcast %94 : vector<1x32xf32> to vector<8x32xf32>
    %116 = arith.addf %114, %115 : vector<8x32xf32>
    %117 = arith.truncf %116 : vector<8x32xf32> to vector<8x32xbf16>
    %c0_37 = arith.constant 0 : index
    %c0_38 = arith.constant 0 : index
    %118 = vector.load %arg8[%c0_37, %c0_38] : memref<32x128xbf16, #tpu.memory_space<vmem>>, vector<32x128xbf16>
    %cst_39 = arith.constant dense<0.000000e+00> : vector<8x128xf32>
    %119 = tpu.matmul %117, %118, %cst_39 {dimension_numbers = #tpu.dot_dimension_numbers<[1], [0], [0], [1], [0, 0, 1, 1], [], []>} : vector<8x32xbf16>, vector<32x128xbf16>, vector<8x128xf32> -> vector<8x128xf32>
    %c0_40 = arith.constant 0 : index
    %c0_41 = arith.constant 0 : index
    %120 = vector.load %arg9[%c0_40, %c0_41] : memref<1x128xf32, #tpu.memory_space<vmem>>, vector<1x128xf32>
    %121 = vector.broadcast %120 : vector<1x128xf32> to vector<8x128xf32>
    %122 = arith.addf %119, %121 : vector<8x128xf32>
    %cst_42 = arith.constant 5.000000e-01 : f32
    %123 = vector.broadcast %cst_42 : f32 to vector<8x128xf32>
    %124 = arith.mulf %123, %122 : vector<8x128xf32>
    %cst_43 = arith.constant 0.707106769 : f32
    %125 = vector.broadcast %cst_43 : f32 to vector<8x128xf32>
    %126 = arith.mulf %122, %125 : vector<8x128xf32>
    %127 = math.erf %126 : vector<8x128xf32>
    %cst_44 = arith.constant 1.000000e+00 : f32
    %128 = vector.broadcast %cst_44 : f32 to vector<8x128xf32>
    %129 = arith.addf %128, %127 : vector<8x128xf32>
    %130 = arith.mulf %124, %129 : vector<8x128xf32>
    %131 = arith.truncf %130 : vector<8x128xf32> to vector<8x128xbf16>
    %c0_45 = arith.constant 0 : index
    %c0_46 = arith.constant 0 : index
    %132 = vector.load %arg10[%c0_45, %c0_46] : memref<128x32xbf16, #tpu.memory_space<vmem>>, vector<128x32xbf16>
    %cst_47 = arith.constant dense<0.000000e+00> : vector<8x32xf32>
    %133 = tpu.matmul %131, %132, %cst_47 {dimension_numbers = #tpu.dot_dimension_numbers<[1], [0], [0], [1], [0, 0, 1, 1], [], []>} : vector<8x128xbf16>, vector<128x32xbf16>, vector<8x32xf32> -> vector<8x32xf32>
    %c0_48 = arith.constant 0 : index
    %c0_49 = arith.constant 0 : index
    %134 = vector.load %arg11[%c0_48, %c0_49] : memref<1x32xf32, #tpu.memory_space<vmem>>, vector<1x32xf32>
    %135 = vector.broadcast %134 : vector<1x32xf32> to vector<8x32xf32>
    %136 = arith.addf %133, %135 : vector<8x32xf32>
    %137 = arith.addf %116, %136 : vector<8x32xf32>
    %c0_50 = arith.constant 0 : index
    %c0_51 = arith.constant 0 : index
    %138 = vector.load %arg12[%c0_50, %c0_51] : memref<1x32xf32, #tpu.memory_space<vmem>>, vector<1x32xf32>
    %c0_52 = arith.constant 0 : index
    %c0_53 = arith.constant 0 : index
    %139 = vector.load %arg13[%c0_52, %c0_53] : memref<1x32xf32, #tpu.memory_space<vmem>>, vector<1x32xf32>
    %cst_54 = arith.constant dense<0.000000e+00> : vector<8xf32>
    %140 = vector.multi_reduction <add>, %137, %cst_54 [1] : vector<8x32xf32> to vector<8xf32>
    %141 = vector.shape_cast %140 : vector<8xf32> to vector<8x1xf32>
    %cst_55 = arith.constant 3.200000e+01 : f32
    %142 = vector.broadcast %cst_55 : f32 to vector<8x1xf32>
    %143 = arith.divf %141, %142 : vector<8x1xf32>
    %144 = vector.broadcast %143 : vector<8x1xf32> to vector<8x32xf32>
    %145 = arith.subf %137, %144 : vector<8x32xf32>
    %146 = arith.mulf %145, %145 : vector<8x32xf32>
    %cst_56 = arith.constant dense<0.000000e+00> : vector<8xf32>
    %147 = vector.multi_reduction <add>, %146, %cst_56 [1] : vector<8x32xf32> to vector<8xf32>
    %148 = vector.shape_cast %147 : vector<8xf32> to vector<8x1xf32>
    %cst_57 = arith.constant 3.200000e+01 : f32
    %149 = vector.broadcast %cst_57 : f32 to vector<8x1xf32>
    %150 = arith.divf %148, %149 : vector<8x1xf32>
    %151 = vector.broadcast %143 : vector<8x1xf32> to vector<8x32xf32>
    %152 = arith.subf %137, %151 : vector<8x32xf32>
    %cst_58 = arith.constant 9.99999974E-6 : f32
    %153 = vector.broadcast %cst_58 : f32 to vector<8x1xf32>
    %154 = arith.addf %150, %153 : vector<8x1xf32>
    %155 = math.rsqrt %154 : vector<8x1xf32>
    %156 = vector.broadcast %155 : vector<8x1xf32> to vector<8x32xf32>
    %157 = arith.mulf %152, %156 : vector<8x32xf32>
    %158 = vector.broadcast %138 : vector<1x32xf32> to vector<8x32xf32>
    %159 = arith.mulf %157, %158 : vector<8x32xf32>
    %160 = vector.broadcast %139 : vector<1x32xf32> to vector<8x32xf32>
    %161 = arith.addf %159, %160 : vector<8x32xf32>
    %162 = vector.shape_cast %161 : vector<8x32xf32> to vector<1x8x32xf32>
    %c0_59 = arith.constant 0 : index
    %c0_60 = arith.constant 0 : index
    %c0_61 = arith.constant 0 : index
    %163 = vector.load %arg14[%c0_59, %c0_60, %c0_61] : memref<1x8x32xf32, #tpu.memory_space<vmem>>, vector<1x8x32xf32>
    tpu.vector_store %arg14[%c0_59, %c0_60, %c0_61], %162 {strides = array<i32>} : memref<1x8x32xf32, #tpu.memory_space<vmem>>, vector<1x8x32xf32>,
    return
  }
  func.func @transform_0(%arg0: i32) -> (i32, i32, i32) {
    %c0_i32 = arith.constant 0 : i32
    %c0_i32_0 = arith.constant 0 : i32
    %c0_i32_1 = arith.constant 0 : i32
    return %arg0, %c0_i32, %c0_i32_0 : i32, i32, i32
  }
  func.func @transform_1(%arg0: i32) -> (i32, i32) {
    %c0_i32 = arith.constant 0 : i32
    %c0_i32_0 = arith.constant 0 : i32
    %c0_i32_1 = arith.constant 0 : i32
    return %c0_i32, %c0_i32_0 : i32, i32
  }
  func.func @transform_2(%arg0: i32) -> (i32, i32) {
    %c0_i32 = arith.constant 0 : i32
    %c0_i32_0 = arith.constant 0 : i32
    %c0_i32_1 = arith.constant 0 : i32
    return %c0_i32, %c0_i32_0 : i32, i32
  }
  func.func @transform_3(%arg0: i32) -> (i32, i32) {
    %c0_i32 = arith.constant 0 : i32
    %c0_i32_0 = arith.constant 0 : i32
    %c0_i32_1 = arith.constant 0 : i32
    return %c0_i32, %c0_i32_0 : i32, i32
  }
  func.func @transform_4(%arg0: i32) -> (i32, i32) {
    %c0_i32 = arith.constant 0 : i32
    %c0_i32_0 = arith.constant 0 : i32
    %c0_i32_1 = arith.constant 0 : i32
    return %c0_i32, %c0_i32_0 : i32, i32
  }
  func.func @transform_5(%arg0: i32) -> (i32, i32) {
    %c0_i32 = arith.constant 0 : i32
    %c0_i32_0 = arith.constant 0 : i32
    %c0_i32_1 = arith.constant 0 : i32
    return %c0_i32, %c0_i32_0 : i32, i32
  }
  func.func @transform_6(%arg0: i32) -> (i32, i32) {
    %c0_i32 = arith.constant 0 : i32
    %c0_i32_0 = arith.constant 0 : i32
    %c0_i32_1 = arith.constant 0 : i32
    return %c0_i32, %c0_i32_0 : i32, i32
  }
  func.func @transform_7(%arg0: i32) -> (i32, i32) {
    %c0_i32 = arith.constant 0 : i32
    %c0_i32_0 = arith.constant 0 : i32
    %c0_i32_1 = arith.constant 0 : i32
    return %c0_i32, %c0_i32_0 : i32, i32
  }
  func.func @transform_8(%arg0: i32) -> (i32, i32) {
    %c0_i32 = arith.constant 0 : i32
    %c0_i32_0 = arith.constant 0 : i32
    %c0_i32_1 = arith.constant 0 : i32
    return %c0_i32, %c0_i32_0 : i32, i32
  }
  func.func @transform_9(%arg0: i32) -> (i32, i32) {
    %c0_i32 = arith.constant 0 : i32
    %c0_i32_0 = arith.constant 0 : i32
    %c0_i32_1 = arith.constant 0 : i32
    return %c0_i32, %c0_i32_0 : i32, i32
  }
  func.func @transform_10(%arg0: i32) -> (i32, i32) {
    %c0_i32 = arith.constant 0 : i32
    %c0_i32_0 = arith.constant 0 : i32
    %c0_i32_1 = arith.constant 0 : i32
    return %c0_i32, %c0_i32_0 : i32, i32
  }
  func.func @transform_11(%arg0: i32) -> (i32, i32) {
    %c0_i32 = arith.constant 0 : i32
    %c0_i32_0 = arith.constant 0 : i32
    %c0_i32_1 = arith.constant 0 : i32
    return %c0_i32, %c0_i32_0 : i32, i32
  }
  func.func @transform_12(%arg0: i32) -> (i32, i32) {
    %c0_i32 = arith.constant 0 : i32
    %c0_i32_0 = arith.constant 0 : i32
    %c0_i32_1 = arith.constant 0 : i32
    return %c0_i32, %c0_i32_0 : i32, i32
  }
  func.func @transform_13(%arg0: i32) -> (i32, i32, i32) {
    %c0_i32 = arith.constant 0 : i32
    %c0_i32_0 = arith.constant 0 : i32
    %c0_i32_1 = arith.constant 0 : i32
    return %arg0, %c0_i32, %c0_i32_0 : i32, i32, i32
  }
}

</mosaic_0001>

<bundles_post_ra>
// kernel: hvt_block.1
= control target key start
LH: loop header
LB: loop body
LE: loop exit
PB: predicated region body
PF: predicated region fallthrough
CT: control target
= control target key end

     0   :  { %s1656_s25 = smov 0   ;;  %s1840_s0 = inlined_call_operand.vmem [shape: f32[2,8,32], index: 0, kind: input, shape index: {}]   ;;  %s1841_s1 = inlined_call_operand.vmem [shape: bf16[32,96], index: 1, kind: input, shape index: {}]   ;;  %s1842_s2 = inlined_call_operand.vmem [shape: f32[1,96], index: 2, kind: input, shape index: {}]   ;;  %s1843_s3 = inlined_call_operand.vmem [shape: bf16[32,32], index: 3, kind: input, shape index: {}]   ;;  %s1844_s4 = inlined_call_operand.vmem [shape: f32[1,32], index: 4, kind: input, shape index: {}]   ;;  %s1845_s5 = inlined_call_operand.vmem [shape: f32[1,32], index: 5, kind: input, shape index: {}]   ;;  %s1846_s6 = inlined_call_operand.vmem [shape: f32[1,32], index: 6, kind: input, shape index: {}]   ;;  %s1847_s7 = inlined_call_operand.vmem [shape: bf16[32,128], index: 7, kind: input, shape index: {}]   ;;  %s1848_s8 = inlined_call_operand.vmem [shape: f32[1,128], index: 8, kind: input, shape index: {}]   ;;  %s1849_s9 = inlined_call_operand.vmem [shape: bf16[128,32], index: 9, kind: input, shape index: {}]   ;;  %s1850_s10 = inlined_call_operand.vmem [shape: f32[1,32], index: 10, kind: input, shape index: {}]   ;;  %s1851_s11 = inlined_call_operand.vmem [shape: f32[1,32], index: 11, kind: input, shape index: {}]   ;;  %s1852_s12 = inlined_call_operand.vmem [shape: f32[1,32], index: 12, kind: input, shape index: {}]   ;;  %s1853_s13 = inlined_call_operand.vmem [shape: f32[2,8,32], index: 13, kind: output, shape index: {}]  }
   0x1 LB: > { %s1334_s26 = sadd.s32 4294967295, %s1568_s25   ;;  %p1338_p0 = scmp.ge.s32.totalorder %s1568_s25, 1  ;;  %s1568_s25 = sphi %s1656_s25, %s23_s25  }
   0x2   : > { %p386_p1 = scmp.lt.s32.totalorder %s1568_s25, 3 }
   0x4   : > { %p387_p2 = pnand %p1338_p0, %p386_p1 }
   0x5   : > { %v1526_v0 = vld [vmem:[%s1841_s1] sm:$0xff] (!%p387_p2)   ;;  %v1570_v1 = vmov (!%p387_p2), 0.0   ;;  %v1527_v2 = vld [vmem:[%s1841_s1 + $0x8] sm:$0xff] (!%p387_p2)   ;;  %vm1571_vm0 = vmmov (!%p387_p2), 0   ;;  %p428_p3 = scmp.lt.s32.totalorder (!%p387_p2), %s1334_s26, 1  ;;  %vm462_vm1 = vcmask (!%p387_p2), 261120  }
   0x6   : > { %390 = sbr.rel (%p387_p2) target bundleno = 2568 (0xa08), region = 72  ;;  %1410 = vmatprep.subr.bf16.mxu0 (!%p387_p2), %v1570_v1  ;;  %1430 = vmatprep.subr.bf16.mxu1 (!%p387_p2), %v1570_v1  ;;  %v1341_v5 = vld [vmem:[%s1842_s2] ss:$0 sm:$0xff] (!%p387_p2)  ;;  %s1572_s20 = smov (!%p387_p2), 96   ;;  %vm512_vm2 = vcmask (!%p387_p2), 64512   ;;  %vm576_vm3 = vcmask (!%p387_p2), 1043456  }
   0x7   : > { %1411 = vmatpush3.bf16.msra.mxu0 (!%p387_p2), %v1526_v0  ;;  %1414 = vmatprep.mubr.msk.bf16.mxu0 (!%p387_p2), %vm1571_vm0, %v1570_v1  ;;  %s1573_s21 = smov (!%p387_p2), 120   ;;  %s1574_s22 = smov (!%p387_p2), 88   ;;  %vm964_vm4 = vcmask (!%p387_p2), 130048   ;;  %vm966_vm5 = vcmask (!%p387_p2), 195584  }
   0x8   : > { %1412 = vmatprep.subr.bf16.mxu0 (!%p387_p2), %v1570_v1  ;;  %1432 = vmatprep.mubr.msk.bf16.mxu1 (!%p387_p2), %vm1571_vm0, %v1570_v1  ;;  %s1575_s23 = smov (!%p387_p2), 80   ;;  %s1576_s24 = smov (!%p387_p2), 112  }
   0x9   : > { %s1577_s27 = smov (!%p387_p2), 72   ;;  %s1578_s28 = smov (!%p387_p2), 104  }
   0xa   : > { %s1579_s29 = smov (!%p387_p2), 56   ;;  %s1580_s30 = smov (!%p387_p2), 64  }
   0xb   : > { %1413 = vmatpush3.bf16.msra.mxu0 (!%p387_p2), %v1527_v2  ;;  %s1581_s15 = smov (!%p387_p2), 40   ;;  %s1582_s16 = smov (!%p387_p2), 48  }
   0xc   : > { %1418 = vmatprep.subr.bf16.mxu0 (!%p387_p2), %v1570_v1 }
   0xd   : > { %s1855_s26 = smov (!%p428_p3, %s1334_s26), 1 }
   0xe   : > { %s1339_s14 = sshll.u32 %s1855_s26, 3 }
   0xf   : > { %s431_s17 = scalar_lea.vmem %s1840_s0, %s1339_s14  ;;  %s435_s18 = scalar_lea.vmem %s1853_s13, %s1339_s14 }
  0x10   : > { %v1686_v3 = vld [vmem:[%s431_s17] sm:$0xff]  ;;  %s1583_s17 = smov 8  }
  0x11   : > { %v438_v4 = vpack.c.bf16 %v1686_v3, %v1686_v3 }
  0x13   : > { %1415 = vmatmul.mubr.msk.bf16.vlgmr.msra.gmra.mrb[0].mxu0 %vm462_vm1, %v438_v4 }
  0x14   : > { %1420 = vmatprep.mubr.msk.bf16.mxu0 %vm1571_vm0, %v1570_v1 }
  0xe6   : > { %v500_v6 = vpop.f32.mrb[0].mxu0 }
  0xe7   : > { %v501_v7 = vadd.f32 %v1341_v5, %v500_v6  ;;  %v1416_v8 = vpop.f32.mrb[1].mxu0 }
  0xe8   : > { %v503_v9 = vpop.f32.mrb[2].mxu0 }
  0xe9   : > { %v506_v10 = vmul.f32 0.35355338, %v501_v7  ;;  %v1696_v11 = vpack.c.bf16 %v501_v7, %v501_v7  ;;  %v1417_v12 = vpop.f32.mrb[3].mxu0 }
  0xeb   : > { %v507_v13 = vpack.c.bf16 %v506_v10, %v506_v10  ;;  %510 = vrot.lane.b32.xlu0 %v1696_v11, %s1572_s20 }
  0xed   : > { %621 = vrot.lane.b32.xlu1 %v507_v13, %s1573_s21 }
  0xef   : > { %623 = vrot.lane.b32.xlu0 %v1696_v11, %s1574_s22  ;;  %s1584_s22 = smov 16  }
  0xf1   : > { %733 = vrot.lane.b32.xlu1 %v1696_v11, %s1575_s23  ;;  %s1585_s23 = smov 24  }
  0xf3   : > { %731 = vrot.lane.b32.xlu0 %v507_v13, %s1576_s24 }
  0xf5   : > { %843 = vrot.lane.b32.xlu1 %v1696_v11, %s1577_s27 }
  0xf7   : > { %841 = vrot.lane.b32.xlu0 %v507_v13, %s1578_s28 }
 0x15d   : > { %v511_v14 = vpop.permute.xlu0 %510 }
 0x15e   : > { %v517_v15 = vsel %vm512_vm2, %v511_v14, 0 }
 0x15f   : > { %1419 = vmatpush3.bf16.xpose.msra.mxu0 %v517_v15  ;;  %v622_v16 = vpop.permute.xlu1 %621 }
 0x160   : > { %1424 = vmatprep.subr.bf16.mxu0 %v1570_v1 }
 0x161   : > { %v624_v17 = vpop.permute.xlu0 %623 }
 0x162   : > { %v629_v18 = vsel %vm512_vm2, %v624_v17, 0 }
 0x163   : > { %1431 = vmatpush3.bf16.xpose.msra.mxu1 %v629_v18  ;;  %v734_v19 = vpop.permute.xlu1 %733 }
 0x164   : > { %1442 = vmatprep.subr.bf16.mxu1 %v1570_v1  ;;  %v739_v20 = vsel %vm512_vm2, %v734_v19, 0 }
 0x165   : > { %v732_v22 = vpop.permute.xlu0 %731 }
 0x166   : > { %1421 = vmatmul.mubr.msk.bf16.vlgmr.msra.gmra.mrb[4].mxu0 %vm512_vm2, %v507_v13 }
 0x167   : > { %1426 = vmatprep.mubr.msk.bf16.mxu0 %vm1571_vm0, %v1570_v1  ;;  %v844_v21 = vpop.permute.xlu1 %843 }
 0x168   : > { %v849_v23 = vsel %vm512_vm2, %v844_v21, 0 }
 0x169   : > { %v842_v24 = vpop.permute.xlu0 %841 }
 0x16a   : > { %1433 = vmatmul.mubr.msk.bf16.vlgmr.msra.gmra.mrb[0].mxu1 %vm512_vm2, %v622_v16 }
 0x16b   : > { %1443 = vmatpush3.bf16.xpose.msra.mxu1 %v739_v20  ;;  %1444 = vmatprep.mubr.msk.bf16.mxu1 %vm1571_vm0, %v1570_v1 }
 0x16c   : > { %1454 = vmatprep.subr.bf16.mxu1 %v1570_v1 }
 0x172   : > { %1445 = vmatmul.mubr.msk.bf16.vlgmr.msra.gmra.mrb[4].mxu1 %vm512_vm2, %v732_v22 }
 0x173   : > { %1455 = vmatpush3.bf16.xpose.msra.mxu1 %v849_v23  ;;  %1456 = vmatprep.mubr.msk.bf16.mxu1 %vm1571_vm0, %v1570_v1 }
 0x174   : > { %1466 = vmatprep.subr.bf16.mxu1 %v1570_v1 }
 0x17a   : > { %1457 = vmatmul.mubr.msk.bf16.vlgmr.msra.gmra.mrb[8].mxu1 %vm512_vm2, %v842_v24 }
 0x17b   : > { %1470 = vmatprep.mubr.msk.bf16.mxu1 %vm1571_vm0, %v1570_v1 }
 0x239   : > { %v553_v25 = vpop.f32.mrb[4].mxu0 }
 0x23a   : > { %v1422_v26 = vpop.f32.mrb[5].mxu0  ;;  %v559_v27 = vsel %vm512_vm2, %v553_v25, -inf }
 0x23b   : > { %560 = vmax.xlane.f32.xlu1 %v559_v27  ;;  %v556_v28 = vpop.f32.mrb[6].mxu0 }
 0x23c   : > { %v1423_v29 = vpop.f32.mrb[7].mxu0 }
 0x23d   : > { %v665_v30 = vpop.f32.mrb[0].mxu1 }
 0x23e   : > { %v1434_v31 = vpop.f32.mrb[1].mxu1  ;;  %v671_v32 = vsel %vm512_vm2, %v665_v30, -inf }
 0x23f   : > { %672 = vmax.xlane.f32.xlu0 %v671_v32  ;;  %v668_v33 = vpop.f32.mrb[2].mxu1 }
 0x240   : > { %v1435_v34 = vpop.f32.mrb[3].mxu1 }
 0x245   : > { %v775_v35 = vpop.f32.mrb[4].mxu1 }
 0x246   : > { %v1446_v36 = vpop.f32.mrb[5].mxu1  ;;  %v781_v37 = vsel %vm512_vm2, %v775_v35, -inf }
 0x247   : > { %782 = vmax.xlane.f32.xlu0 %v781_v37  ;;  %v778_v38 = vpop.f32.mrb[6].mxu1  ;;  %v1529_v36 = vld [vmem:[%s1843_s3 + $0x8] sm:$0xff]  }
 0x248   : > { %v1447_v39 = vpop.f32.mrb[7].mxu1 }
 0x24d   : > { %v885_v40 = vpop.f32.mrb[8].mxu1 }
 0x24e   : > { %v1458_v41 = vpop.f32.mrb[9].mxu1  ;;  %v891_v42 = vsel %vm512_vm2, %v885_v40, -inf }
 0x24f   : > { %v888_v43 = vpop.f32.mrb[10].mxu1  ;;  %892 = vmax.xlane.f32.xlu1 %v891_v42 }
 0x250   : > { %v1459_v44 = vpop.f32.mrb[11].mxu1 }
 0x2c8   : > { %v561_v45 = vpop.xlane.xlu1 %560 }
 0x2c9   : > { %v562_v46 = vsub.f32 %v553_v25, %v561_v45 }
 0x2cb   : > { %v563_v47 = vmul.f32 1.442695, %v562_v46 }
 0x2cc   : > { %v673_v48 = vpop.xlane.xlu0 %672 }
 0x2cd   : > { %1540 = vpow2.f32 %v563_v47  ;;  %v674_v49 = vsub.f32 %v665_v30, %v673_v48 }
 0x2cf   : > { %v675_v50 = vmul.f32 1.442695, %v674_v49 }
 0x2d1   : > { %1542 = vpow2.f32 %v675_v50 }
 0x2d4   : > { %v783_v51 = vpop.xlane.xlu0 %782 }
 0x2d5   : > { %v784_v52 = vsub.f32 %v775_v35, %v783_v51  ;;  %v1528_v35 = vld [vmem:[%s1843_s3] sm:$0xff]  }
 0x2d6   : > { %1467 = vmatpush3.bf16.msra.mxu1 %v1528_v35 }
 0x2d7   : > { %v1541_v53 = vpop.eup %1540  ;;  %v785_v54 = vmul.f32 1.442695, %v784_v52  ;;  %1468 = vmatprep.subr.bf16.mxu1 %v1570_v1  ;;  %v1353_v52 = vld [vmem:[%s1844_s4] ss:$0 sm:$0xff] }
 0x2d8   : > { %v565_v55 = vsel %vm512_vm2, %v1541_v53, 0.0 }
 0x2d9   : > { %1544 = vpow2.f32 %v785_v54  ;;  %566 = vadd.xlane.f32.xlu0 %v565_v55 }
 0x2da   : > { %1469 = vmatpush3.bf16.msra.mxu1 %v1529_v36 }
 0x2db   : > { %v1543_v56 = vpop.eup %1542  ;;  %1482 = vmatprep.subr.bf16.mxu1 %v1570_v1 }
 0x2dc   : > { %v677_v57 = vsel %vm512_vm2, %v1543_v56, 0.0  ;;  %v893_v60 = vpop.xlane.xlu1 %892 }
 0x2dd   : > { %678 = vadd.xlane.f32.xlu1 %v677_v57  ;;  %v894_v61 = vsub.f32 %v885_v40, %v893_v60 }
 0x2df   : > { %v895_v62 = vmul.f32 1.442695, %v894_v61 }
 0x2e1   : > { %1546 = vpow2.f32 %v895_v62 }
 0x2e3   : > { %v1545_v58 = vpop.eup %1544 }
 0x2e4   : > { %v787_v59 = vsel %vm512_vm2, %v1545_v58, 0.0 }
 0x2e5   : > { %788 = vadd.xlane.f32.xlu0 %v787_v59 }
 0x2eb   : > { %v1547_v63 = vpop.eup %1546 }
 0x2ec   : > { %v897_v0 = vsel %vm512_vm2, %v1547_v63, 0.0 }
 0x2ee   : > { %683 = vrot.lane.b32.xlu1 %v1696_v11, %s1579_s29 }
 0x2fb   : > { %571 = vrot.lane.b32.xlu0 %v1696_v11, %s1580_s30 }
 0x2ff   : > { %903 = vrot.lane.b32.xlu0 %v1696_v11, %s1581_s15 }
 0x312   : > { %898 = vadd.xlane.f32.xlu1 %v897_v0 }
 0x323   : > { %793 = vrot.lane.b32.xlu1 %v1696_v11, %s1582_s16 }
 0x366   : > { %v567_v2 = vpop.xlane.xlu0 %566 }
 0x367   : > { %1548 = vrcp.f32 %v567_v2  ;;  %v1530_v2 = vld [vmem:[%s1847_s7] sm:$0xff]  }
 0x36a   : > { %v679_v4 = vpop.xlane.xlu1 %678 }
 0x36b   : > { %1550 = vrcp.f32 %v679_v4  ;;  %v1532_v4 = vld [vmem:[%s1849_s9] sm:$0xff]  }
 0x36e   : > { %v684_v10 = vpop.permute.xlu1 %683 }
 0x36f   : > { %v689_v14 = vsel %vm576_vm3, %v684_v10, 0 }
 0x371   : > { %v1549_v5 = vpop.eup %1548 }
 0x372   : > { %v789_v6 = vpop.xlane.xlu0 %788  ;;  %v569_v7 = vmul.f32 %v1549_v5, %v1541_v53  ;;  %v1533_v5 = vld [vmem:[%s1849_s9 + $0x8] sm:$0xff]  }
 0x373   : > { %1552 = vrcp.f32 %v789_v6  ;;  %v1534_v6 = vld [vmem:[%s1849_s9 + $0x10] sm:$0xff]  }
 0x374   : > { %v570_v12 = vpack.c.bf16 %v569_v7, %v569_v7 }
 0x375   : > { %v1551_v13 = vpop.eup %1550 }
 0x376   : > { %v572_v8 = vpop.permute.xlu0 %571  ;;  %v681_v11 = vmul.f32 %v1551_v13, %v1543_v56 }
 0x377   : > { %v578_v9 = vsel %vm576_vm3, %v572_v8, 0 }
 0x378   : > { %1425 = vmatpush3.bf16.msra.mxu0 %v578_v9  ;;  %v682_v15 = vpack.c.bf16 %v681_v11, %v681_v11 }
 0x379   : > { %1436 = vmatprep.subr.bf16.mxu0 %v1570_v1 }
 0x37a   : > { %v904_v21 = vpop.permute.xlu0 %903 }
 0x37b   : > { %1427 = vmatmul.mubr.msk.bf16.vlgmr.msra.gmra.mrb[8].mxu0 %vm512_vm2, %v570_v12  ;;  %v909_v23 = vsel %vm576_vm3, %v904_v21, 0  ;;  %v1357_v12 = vld [vmem:[%s1845_s5] ss:$0 sm:$0xff]  ;;  %v1539_v21 = vld [vmem:[%s1849_s9 + $0x38] sm:$0xff]  }
 0x37c   : > { %1437 = vmatpush3.bf16.msra.mxu0 %v689_v14  ;;  %1438 = vmatprep.mubr.msk.bf16.mxu0 %vm1571_vm0, %v1570_v1  ;;  %v1358_v14 = vld [vmem:[%s1846_s6] ss:$0 sm:$0xff] }
 0x37d   : > { %1448 = vmatprep.subr.bf16.mxu0 %v1570_v1  ;;  %v1553_v16 = vpop.eup %1552 }
 0x37e   : > { %v791_v18 = vmul.f32 %v1553_v16, %v1545_v58 }
 0x380   : > { %v792_v22 = vpack.c.bf16 %v791_v18, %v791_v18  ;;  %v1536_v18 = vld [vmem:[%s1849_s9 + $0x20] sm:$0xff]  }
 0x383   : > { %1439 = vmatmul.mubr.msk.bf16.vlgmr.msra.gmra.mrb[12].mxu0 %vm512_vm2, %v682_v15 }
 0x384   : > { %1450 = vmatprep.mubr.msk.bf16.mxu0 %vm1571_vm0, %v1570_v1 }
 0x39f   : > { %v899_v17 = vpop.xlane.xlu1 %898 }
 0x3a0   : > { %1554 = vrcp.f32 %v899_v17  ;;  %v1535_v17 = vld [vmem:[%s1849_s9 + $0x18] sm:$0xff]  }
 0x3a3   : > { %v794_v19 = vpop.permute.xlu1 %793 }
 0x3a4   : > { %v799_v20 = vsel %vm576_vm3, %v794_v19, 0  ;;  %v1537_v19 = vld [vmem:[%s1849_s9 + $0x28] sm:$0xff]  }
 0x3a5   : > { %1449 = vmatpush3.bf16.msra.mxu0 %v799_v20  ;;  %v1538_v20 = vld [vmem:[%s1849_s9 + $0x30] sm:$0xff]  }
 0x3a6   : > { %1460 = vmatprep.subr.bf16.mxu0 %v1570_v1 }
 0x3a8   : > { %1451 = vmatmul.mubr.msk.bf16.vlgmr.msra.gmra.mrb[16].mxu0 %vm512_vm2, %v792_v22  ;;  %v1359_v22 = vld [vmem:[%s1848_s8] ss:$0 sm:$0xff] }
 0x3a9   : > { %1461 = vmatpush3.bf16.msra.mxu0 %v909_v23  ;;  %1462 = vmatprep.mubr.msk.bf16.mxu0 %vm1571_vm0, %v1570_v1 }
 0x3aa   : > { %v1555_v24 = vpop.eup %1554  ;;  %1474 = vmatprep.subr.bf16.mxu0 %v1570_v1 }
 0x3ab   : > { %v901_v25 = vmul.f32 %v1555_v24, %v1547_v63 }
 0x3ad   : > { %v902_v26 = vpack.c.bf16 %v901_v25, %v901_v25 }
 0x3b0   : > { %1463 = vmatmul.mubr.msk.bf16.vlgmr.msra.gmra.mrb[20].mxu0 %vm512_vm2, %v902_v26 }
 0x3b1   : > { %1478 = vmatprep.mubr.msk.bf16.mxu0 %vm1571_vm0, %v1570_v1  ;;  %1475 = vmatpush3.bf16.msra.mxu0 %v1530_v2 }
 0x3b2   : > { %1476 = vmatprep.subr.bf16.mxu0 %v1570_v1 }
 0x44e   : > { %v614_v27 = vpop.f32.mrb[8].mxu0 }
 0x44f   : > { %v1428_v28 = vpop.f32.mrb[9].mxu0 }
 0x450   : > { %v617_v29 = vpop.f32.mrb[10].mxu0 }
 0x451   : > { %v1429_v30 = vpop.f32.mrb[11].mxu0 }
 0x456   : > { %v725_v31 = vpop.f32.mrb[12].mxu0 }
 0x457   : > { %952 = vrot.lane.b32.xlu1 %v725_v31, %s1583_s17  ;;  %v1440_v32 = vpop.f32.mrb[13].mxu0 }
 0x458   : > { %v728_v33 = vpop.f32.mrb[14].mxu0 }
 0x459   : > { %v1441_v34 = vpop.f32.mrb[15].mxu0  ;;  %v1363_v33 = vld [vmem:[%s1850_s10] ss:$0 sm:$0xff] }
 0x47b   : > { %v835_v37 = vpop.f32.mrb[16].mxu0 }
 0x47c   : > { %956 = vrot.lane.b32.xlu0 %v835_v37, %s1584_s22  ;;  %v1452_v38 = vpop.f32.mrb[17].mxu0 }
 0x47d   : > { %v838_v39 = vpop.f32.mrb[18].mxu0 }
 0x47e   : > { %v1453_v40 = vpop.f32.mrb[19].mxu0 }
 0x483   : > { %v945_v41 = vpop.f32.mrb[20].mxu0 }
 0x484   : > { %960 = vrot.lane.b32.xlu1 %v945_v41, %s1585_s23  ;;  %v1464_v42 = vpop.f32.mrb[21].mxu0 }
 0x485   : > { %v948_v43 = vpop.f32.mrb[22].mxu0 }
 0x486   : > { %v1465_v44 = vpop.f32.mrb[23].mxu0 }
 0x4c9   : > { %v953_v45 = vpop.permute.xlu1 %952 }
 0x4ca   : > { %v963_v47 = vsel %vm512_vm2, %v614_v27, %v953_v45 }
 0x4ee   : > { %v957_v46 = vpop.permute.xlu0 %956 }
 0x4ef   : > { %v965_v48 = vsel %vm964_vm4, %v963_v47, %v957_v46 }
 0x4f6   : > { %v961_v49 = vpop.permute.xlu1 %960 }
 0x4f7   : > { %v967_v50 = vsel %vm966_vm5, %v965_v48, %v961_v49 }
 0x4f8   : > { %v968_v51 = vpack.c.bf16 %v967_v50, %v967_v50  ;;  %v1372_v50 = vld [vmem:[%s1851_s11] ss:$0 sm:$0xff] }
 0x4fa   : > { %1471 = vmatmul.mubr.msk.bf16.vlgmr.msra.gmra.mrb[12].mxu1 %vm462_vm1, %v968_v51 }
 0x4fb   : > { %1498 = vmatprep.mubr.msk.bf16.mxu1 %vm1571_vm0, %v1570_v1  ;;  %1483 = vmatpush3.bf16.msra.mxu1 %v1532_v4 }
 0x4fc   : > { %1484 = vmatprep.subr.bf16.mxu1 %v1570_v1 }
 0x4ff   : > { %1485 = vmatpush3.bf16.msra.mxu1 %v1533_v5 }
 0x500   : > { %1486 = vmatprep.subr.bf16.mxu1 %v1570_v1 }
 0x503   : > { %1487 = vmatpush3.bf16.msra.mxu1 %v1534_v6 }
 0x504   : > { %1488 = vmatprep.subr.bf16.mxu1 %v1570_v1 }
 0x507   : > { %1489 = vmatpush3.bf16.msra.mxu1 %v1535_v17 }
 0x508   : > { %1490 = vmatprep.subr.bf16.mxu1 %v1570_v1 }
 0x50b   : > { %1491 = vmatpush3.bf16.msra.mxu1 %v1536_v18 }
 0x50c   : > { %1492 = vmatprep.subr.bf16.mxu1 %v1570_v1 }
 0x50f   : > { %1493 = vmatpush3.bf16.msra.mxu1 %v1537_v19 }
 0x510   : > { %1494 = vmatprep.subr.bf16.mxu1 %v1570_v1 }
 0x513   : > { %1495 = vmatpush3.bf16.msra.mxu1 %v1538_v20 }
 0x514   : > { %1496 = vmatprep.subr.bf16.mxu1 %v1570_v1 }
 0x517   : > { %1497 = vmatpush3.bf16.msra.mxu1 %v1539_v21 }
 0x5cd   : > { %v1029_v53 = vpop.f32.mrb[12].mxu1 }
 0x5ce   : > { %v1030_v54 = vadd.f32 %v1353_v52, %v1029_v53  ;;  %v1472_v55 = vpop.f32.mrb[13].mxu1  ;;  %v1373_v52 = vld [vmem:[%s1852_s12] ss:$0 sm:$0xff] }
 0x5cf   : > { %v1032_v56 = vpop.f32.mrb[14].mxu1 }
 0x5d0   : > { %v1473_v57 = vpop.f32.mrb[15].mxu1  ;;  %v1035_v58 = vadd.f32 %v1030_v54, %v1686_v3  ;;  %v1531_v3 = vld [vmem:[%s1847_s7 + $0x8] sm:$0xff]  }
 0x5d1   : > { %1477 = vmatpush3.bf16.msra.mxu0 %v1531_v3 }
 0x5d2   : > { %v1038_v59 = vsel %vm462_vm1, %v1035_v58, 0.0 }
 0x5d3   : > { %1039 = vadd.xlane.f32.xlu0 %v1038_v59 }
 0x660   : > { %v1040_v60 = vpop.xlane.xlu0 %1039 }
 0x661   : > { %v1042_v61 = vmul.f32 0.03125, %v1040_v60 }
 0x663   : > { %v1043_v62 = vsub.f32 %v1035_v58, %v1042_v61 }
 0x665   : > { %v1044_v63 = vmul.f32 %v1043_v62, %v1043_v62 }
 0x667   : > { %v1045_v0 = vsel %vm462_vm1, %v1044_v63, 0.0 }
 0x668   : > { %1046 = vadd.xlane.f32.xlu1 %v1045_v0 }
 0x6f5   : > { %v1047_v7 = vpop.xlane.xlu1 %1046 }
 0x6f6   : > { %v1048_v8 = vmul.f32 0.03125, %v1047_v7 }
 0x6f8   : > { %v1049_v9 = vadd.f32 1e-05, %v1048_v8 }
 0x6fa   : > { %1556 = vrsqrt.f32 %v1049_v9 }
 0x704   : > { %v1557_v10 = vpop.eup %1556 }
 0x705   : > { %v1051_v13 = vmul.f32 %v1557_v10, %v1043_v62 }
 0x707   : > { %v1058_v11 = vmul.f32 %v1357_v12, %v1051_v13 }
 0x709   : > { %v1065_v15 = vadd.f32 %v1358_v14, %v1058_v11 }
 0x70b   : > { %v1066_v16 = vpack.c.bf16 %v1065_v15, %v1065_v15 }
 0x70d   : > { %1479 = vmatmul.mubr.msk.bf16.vlgmr.msra.gmra.mrb[24].mxu0 %vm462_vm1, %v1066_v16 }
 0x7e0   : > { %v1127_v23 = vpop.f32.mrb[24].mxu0 }
 0x7e1   : > { %v1128_v24 = vadd.f32 %v1359_v22, %v1127_v23  ;;  %v1480_v25 = vpop.f32.mrb[25].mxu0 }
 0x7e2   : > { %v1130_v26 = vpop.f32.mrb[26].mxu0 }
 0x7e3   : > { %v1134_v27 = vmul.f32 0.70710677, %v1128_v24  ;;  %v1481_v28 = vpop.f32.mrb[27].mxu0  ;;  %v1133_v30 = vmul.f32 0.5, %v1128_v24 }
 0x7e5   : > { %1558 = verf.f32 %v1134_v27 }
 0x7ef   : > { %v1559_v29 = vpop.eup %1558 }
 0x7f0   : > { %v1136_v31 = vadd.f32 1.0, %v1559_v29 }
 0x7f2   : > { %v1137_v1 = vmul.f32 %v1136_v31, %v1133_v30 }
 0x7f4   : > { %v1138_v32 = vpack.c.bf16 %v1137_v1, %v1137_v1 }
 0x7f6   : > { %1499 = vmatmul.mubr.bf16.vlgmr.msra.gmra.mrb[16].mxu1 %v1138_v32 }
 0x8c9   : > { %v1244_v34 = vpop.f32.mrb[16].mxu1 }
 0x8ca   : > { %v1245_v35 = vadd.f32 %v1363_v33, %v1244_v34  ;;  %v1500_v36 = vpop.f32.mrb[17].mxu1 }
 0x8cb   : > { %v1247_v37 = vpop.f32.mrb[18].mxu1 }
 0x8cc   : > { %v1501_v38 = vpop.f32.mrb[19].mxu1  ;;  %v1250_v39 = vadd.f32 %v1245_v35, %v1065_v15 }
 0x8ce   : > { %v1253_v40 = vsel %vm462_vm1, %v1250_v39, 0.0 }
 0x8cf   : > { %1254 = vadd.xlane.f32.xlu0 %v1253_v40 }
 0x95c   : > { %v1255_v41 = vpop.xlane.xlu0 %1254 }
 0x95d   : > { %v1256_v42 = vmul.f32 0.03125, %v1255_v41 }
 0x95f   : > { %v1257_v43 = vsub.f32 %v1250_v39, %v1256_v42 }
 0x961   : > { %v1258_v44 = vmul.f32 %v1257_v43, %v1257_v43 }
 0x963   : > { %v1259_v45 = vsel %vm462_vm1, %v1258_v44, 0.0 }
 0x964   : > { %1260 = vadd.xlane.f32.xlu0 %v1259_v45 }
 0x9f1   : > { %v1261_v46 = vpop.xlane.xlu0 %1260 }
 0x9f2   : > { %v1262_v47 = vmul.f32 0.03125, %v1261_v46 }
 0x9f4   : > { %v1263_v48 = vadd.f32 1e-05, %v1262_v47 }
 0x9f6   : > { %1560 = vrsqrt.f32 %v1263_v48 }
 0xa00   : > { %v1561_v49 = vpop.eup %1560 }
 0xa01   : > { %v1265_v51 = vmul.f32 %v1561_v49, %v1257_v43 }
 0xa03   : > { %v1272_v53 = vmul.f32 %v1372_v50, %v1265_v51 }
 0xa05   : > { %v1279_v54 = vadd.f32 %v1373_v52, %v1272_v53 }
 0xa07   : > { %1280 = vst.msk [vmem:[%s435_s18] sm:$0xff] %vm462_vm1, %v1279_v54 }
 0xa08 PF: > { %s23_s25 = sadd.s32 1, %s1568_s25  }
 0xa09   : > { %p20_p4 = scmp.ge.s32.totalorder %s23_s25, 4  }
 0xa0b   :  { %22 = sbr.rel (!%p20_p4) target bundleno = 1 (0x1), region = 102 }

</bundles_post_ra>
